<compile_context>
chip_gen: v5e
topology: v5e:2x2
jax: 0.10.0
libtpu: 0.0.40
codegen_flags: <defaults>
</compile_context>

<pallas_src>
import jax
import jax.numpy as jnp
from jax.experimental import pallas as pl
from jax.experimental.pallas import tpu as pltpu


def _make_fire_kernel(H, W, L, matmul_dtype):
    """L = images_per_step * H * W (lane axis length)."""

    def fire_conv_kernel(x_ref, mask_ref, wsq_ref, bsq_ref, w1_ref, b1_ref,
                         w3_ref, b3_ref, out_ref, im2col_ref):
        # x_ref: (1, Cin, L)   out_ref: (1, C2+C3, L)   im2col_ref: (9*C1, L)
        C1 = wsq_ref.shape[0]
        C2 = w1_ref.shape[0]

        x = x_ref[0]                                                  # (Cin, L) f32

        # --- squeeze 1x1 conv + ReLU ---------------------------------------
        s = jnp.dot(wsq_ref[...], x.astype(matmul_dtype),
                    preferred_element_type=jnp.float32)               # (C1, L)
        s = jnp.maximum(s + bsq_ref[...], 0.0)                        # f32

        # --- expand 1x1 conv + ReLU -> out[:C2] (sublane-aligned slice) -----
        e1 = jnp.dot(w1_ref[...], s.astype(matmul_dtype),
                     preferred_element_type=jnp.float32)
        e1 = jnp.maximum(e1 + b1_ref[...], 0.0)
        out_ref[0, :C2, :] = e1.astype(out_ref.dtype)

        # --- expand 3x3 conv (padding=1) + ReLU ------------------------------
        # In-register im2col: 8 lane rolls (XLU slot) * precomputed border
        # masks (single VPU multiply per tap), written into VMEM scratch rows
        # [k*C1:(k+1)*C1], then ONE K=9*C1 MXU matmul.
        # Periodic per-image masks make the global roll safe for lane-stacked
        # batches (any wrapped/out-of-image tap is multiplied by 0).
        k = 0
        for dh in (-1, 0, 1):
            for dw in (-1, 0, 1):
                off = dh * W + dw
                # result[p] = s[(p + off) mod L]  (np.roll semantics)
                t = s if off == 0 else pltpu.roll(s, (-off) % L, 1)
                t = t * mask_ref[k:k + 1, :]          # zero out-of-image taps
                im2col_ref[k * C1:(k + 1) * C1, :] = t.astype(matmul_dtype)
                k += 1

        e3 = jnp.dot(w3_ref[...], im2col_ref[...],
                     preferred_element_type=jnp.float32)
        e3 = jnp.maximum(e3 + b3_ref[...], 0.0)
        out_ref[0, C2:, :] = e3.astype(out_ref.dtype)

    return fire_conv_kernel


def _border_masks(H, W, images_per_step):
    """(9, images_per_step*H*W) 0/1 f32 masks, one row per 3x3 tap (k=kh*3+kw),
    tiled per image so they are periodic along the stacked lane axis."""
    lane = jnp.arange(H * W)
    h = lane // W
    w = lane % W
    rows = []
    for dh in (-1, 0, 1):
        for dw in (-1, 0, 1):
            ok = ((h + dh >= 0) & (h + dh <= H - 1)
                  & (w + dw >= 0) & (w + dw <= W - 1))
            rows.append(ok)
    m = jnp.stack(rows, axis=0).astype(jnp.float32)        # (9, HW)
    return jnp.tile(m, (1, images_per_step))                # (9, Bn*HW)


def fire_conv(x_nchw, params, *, matmul_dtype=jnp.float32):
    wsq, bsq, w1, b1, w3, b3 = params
    N, Cin, H, W = x_nchw.shape
    C1, C2, C3 = wsq.shape[0], w1.shape[0], w3.shape[0]
    Cout = C2 + C3
    HW = H * W

    # Stack Bn images onto the lane axis per grid step (fatter MXU N-dim, fewer
    # grid steps).  Keep 2 grid steps when N >= 2 so both v7x TensorCores get
    # work; on v5e/v6e (1 TC) the "parallel" tag is a no-op.
    num_steps = 2 if N >= 2 else 1
    Bn = -(-N // num_steps)                     # images per grid step
    Npad = num_steps * Bn
    if Npad != N:
        x_nchw = jnp.pad(x_nchw, ((0, Npad - N), (0, 0), (0, 0), (0, 0)))
    L = Bn * HW                                  # lane-axis length per step

    # NCHW is already channel-first; stacking Bn images on lanes is a trivial
    # reshape/transpose at these sizes.
    x = (x_nchw.reshape(num_steps, Bn, Cin, HW)
               .transpose(0, 2, 1, 3)
               .reshape(num_steps, Cin, L))

    masks = _border_masks(H, W, Bn)

    # Matmul operands in matmul_dtype (bf16 recommended on v6e/v7x for full MXU
    # rate, f32 default preserves exact Conv2d numerics).  Biases & all
    # elementwise math stay f32.
    wsq_mm = wsq.astype(matmul_dtype)
    w1_mm = w1.astype(matmul_dtype)
    w3_mm = w3.reshape(C3, 9 * C1).astype(matmul_dtype)

    # VMEM footprint per step: (Cin + Cout)*L + 9*L + 9*C1*L words -- far below
    # the scoped default on every generation at these sizes.
    # TODO(synk): if scaled to real SqueezeNet shapes (HW~3136, Cin~512) or
    # large Bn, re-budget for v7x's 64 MiB VMEM and set vmem_limit_bytes.
    out = pl.pallas_call(
        _make_fire_kernel(H, W, L, matmul_dtype),
        out_shape=jax.ShapeDtypeStruct((num_steps, Cout, L), jnp.float32),
        grid_spec=pltpu.PrefetchScalarGridSpec(
            num_scalar_prefetch=0,
            grid=(num_steps,),
            in_specs=[
                pl.BlockSpec((1, Cin, L), lambda n: (n, 0, 0)),
                pl.BlockSpec((9, L), lambda n: (0, 0)),        # masks, resident
                pl.BlockSpec((C1, Cin), lambda n: (0, 0)),
                pl.BlockSpec((C1, 1), lambda n: (0, 0)),
                pl.BlockSpec((C2, C1), lambda n: (0, 0)),
                pl.BlockSpec((C2, 1), lambda n: (0, 0)),
                pl.BlockSpec((C3, 9 * C1), lambda n: (0, 0)),
                pl.BlockSpec((C3, 1), lambda n: (0, 0)),
            ],
            out_specs=pl.BlockSpec((1, Cout, L), lambda n: (n, 0, 0)),
            scratch_shapes=[pltpu.VMEM((9 * C1, L), matmul_dtype)],
        ),
        compiler_params=pltpu.CompilerParams(
            dimension_semantics=("parallel",)),
    )(x, masks, wsq_mm, bsq, w1_mm, b1, w3_mm, b3)

    out = (out.reshape(num_steps, Cout, Bn, HW)
              .transpose(0, 2, 1, 3)
              .reshape(Npad, Cout, H, W))
    return out[:N]


def fire_conv_ref(x_nchw, params):
    """Pure-JAX reference (NCHW throughout), matching PyTorch FireConv semantics."""
    wsq, bsq, w1, b1, w3, b3 = params
    C3, _, C1 = w3.shape

    s = jax.nn.relu(jnp.einsum('oc,nchw->nohw', wsq, x_nchw) + bsq[None, :, :, None])
    e1 = jax.nn.relu(jnp.einsum('oc,nchw->nohw', w1, s) + b1[None, :, :, None])

    # (C3, 9, C1) with k = kh*3 + kw  ->  OIHW (C3, C1, 3, 3)
    w3_oihw = w3.reshape(C3, 3, 3, C1).transpose(0, 3, 1, 2)
    e3 = jax.lax.conv_general_dilated(
        s, w3_oihw, window_strides=(1, 1), padding=((1, 1), (1, 1)),
        dimension_numbers=('NCHW', 'OIHW', 'NCHW'))
    e3 = jax.nn.relu(e3 + b3[None, :, :, None])

    return jnp.concatenate([e1, e3], axis=1)


if __name__ == "__main__":
    key = jax.random.PRNGKey(0)
    N, Cin, H, W = 2, 4, 16, 16           # inplanes=4
    C1, C2, C3 = 8, 16, 16                # c1=8, c2=16, c3=16

    ks = jax.random.split(key, 7)
    x = jax.random.normal(ks[0], (N, Cin, H, W), jnp.float32)
    wsq = 0.1 * jax.random.normal(ks[1], (C1, Cin), jnp.float32)
    bsq = 0.1 * jax.random.normal(ks[2], (C1, 1), jnp.float32)
    w1 = 0.1 * jax.random.normal(ks[3], (C2, C1), jnp.float32)
    b1 = 0.1 * jax.random.normal(ks[4], (C2, 1), jnp.float32)
    w3 = 0.1 * jax.random.normal(ks[5], (C3, 9, C1), jnp.float32)
    b3 = 0.1 * jax.random.normal(ks[6], (C3, 1), jnp.float32)
    params = (wsq, bsq, w1, b1, w3, b3)

    ref = fire_conv_ref(x, params)

    # Exact-numerics path (f32 matmuls), matches PyTorch Conv2d semantics.
    out_f32 = jax.block_until_ready(fire_conv(x, params, matmul_dtype=jnp.float32))
    assert out_f32.shape == (N, C2 + C3, H, W), out_f32.shape
    assert jnp.allclose(out_f32, ref, atol=1e-4, rtol=1e-4), \
        float(jnp.max(jnp.abs(out_f32 - ref)))

    # Fast path for v6e/v7x: bf16 MXU operands, f32 accumulation (precision tradeoff).
    out_bf16 = jax.block_until_ready(fire_conv(x, params, matmul_dtype=jnp.bfloat16))
    assert jnp.allclose(out_bf16, ref, atol=2e-2, rtol=2e-2), \
        float(jnp.max(jnp.abs(out_bf16 - ref)))

    print("KERNEL_OK")
</pallas_src>

<mosaic_0001>
module attributes {stable_mosaic.version = 11 : i64} {
  func.func @fire_conv_kernel(%arg0: i32, %arg1: memref<1x4x256xf32, #tpu.memory_space<vmem>>, %arg2: memref<9x256xf32, #tpu.memory_space<vmem>>, %arg3: memref<8x4xf32, #tpu.memory_space<vmem>>, %arg4: memref<8x1xf32, #tpu.memory_space<vmem>>, %arg5: memref<16x8xf32, #tpu.memory_space<vmem>>, %arg6: memref<16x1xf32, #tpu.memory_space<vmem>>, %arg7: memref<16x72xf32, #tpu.memory_space<vmem>>, %arg8: memref<16x1xf32, #tpu.memory_space<vmem>>, %arg9: memref<1x32x256xf32, #tpu.memory_space<vmem>>, %arg10: memref<72x256xf32, #tpu.memory_space<vmem>>) attributes {dimension_semantics = [#tpu.dimension_semantics<parallel>], iteration_bounds = array<i64: 2>, scalar_prefetch = 0 : i64, scratch_operands = 1 : i64, tpu.core_type = #tpu.core_type<tc>, window_params = [{transform_indices = @transform_0, window_bounds = array<i64: 1, 4, 256>}, {pipeline_mode = #tpu.pipeline_mode<synchronous>, transform_indices = @transform_1, window_bounds = array<i64: 9, 256>}, {pipeline_mode = #tpu.pipeline_mode<synchronous>, transform_indices = @transform_2, window_bounds = array<i64: 8, 4>}, {pipeline_mode = #tpu.pipeline_mode<synchronous>, transform_indices = @transform_3, window_bounds = array<i64: 8, 1>}, {pipeline_mode = #tpu.pipeline_mode<synchronous>, transform_indices = @transform_4, window_bounds = array<i64: 16, 8>}, {pipeline_mode = #tpu.pipeline_mode<synchronous>, transform_indices = @transform_5, window_bounds = array<i64: 16, 1>}, {pipeline_mode = #tpu.pipeline_mode<synchronous>, transform_indices = @transform_6, window_bounds = array<i64: 16, 72>}, {pipeline_mode = #tpu.pipeline_mode<synchronous>, transform_indices = @transform_7, window_bounds = array<i64: 16, 1>}, {transform_indices = @transform_8, window_bounds = array<i64: 1, 32, 256>}]} {
    %c0 = arith.constant 0 : index
    %c0_0 = arith.constant 0 : index
    %c0_1 = arith.constant 0 : index
    %0 = vector.load %arg1[%c0, %c0_0, %c0_1] : memref<1x4x256xf32, #tpu.memory_space<vmem>>, vector<1x4x256xf32>
    %1 = vector.shape_cast %0 : vector<1x4x256xf32> to vector<4x256xf32>
    %c0_2 = arith.constant 0 : index
    %c0_3 = arith.constant 0 : index
    %2 = vector.load %arg3[%c0_2, %c0_3] : memref<8x4xf32, #tpu.memory_space<vmem>>, vector<8x4xf32>
    %cst = arith.constant dense<0.000000e+00> : vector<8x256xf32>
    %3 = tpu.matmul %2, %1, %cst {dimension_numbers = #tpu.dot_dimension_numbers<[1], [0], [0], [1], [0, 0, 1, 1], [], []>} : vector<8x4xf32>, vector<4x256xf32>, vector<8x256xf32> -> vector<8x256xf32>
    %c0_4 = arith.constant 0 : index
    %c0_5 = arith.constant 0 : index
    %4 = vector.load %arg4[%c0_4, %c0_5] : memref<8x1xf32, #tpu.memory_space<vmem>>, vector<8x1xf32>
    %5 = vector.broadcast %4 : vector<8x1xf32> to vector<8x256xf32>
    %6 = arith.addf %3, %5 : vector<8x256xf32>
    %cst_6 = arith.constant 0.000000e+00 : f32
    %7 = vector.broadcast %cst_6 : f32 to vector<8x256xf32>
    %8 = arith.maximumf %6, %7 : vector<8x256xf32>
    %c0_7 = arith.constant 0 : index
    %c0_8 = arith.constant 0 : index
    %9 = vector.load %arg5[%c0_7, %c0_8] : memref<16x8xf32, #tpu.memory_space<vmem>>, vector<16x8xf32>
    %cst_9 = arith.constant dense<0.000000e+00> : vector<16x256xf32>
    %10 = tpu.matmul %9, %8, %cst_9 {dimension_numbers = #tpu.dot_dimension_numbers<[1], [0], [0], [1], [0, 0, 1, 1], [], []>} : vector<16x8xf32>, vector<8x256xf32>, vector<16x256xf32> -> vector<16x256xf32>
    %c0_10 = arith.constant 0 : index
    %c0_11 = arith.constant 0 : index
    %11 = vector.load %arg6[%c0_10, %c0_11] : memref<16x1xf32, #tpu.memory_space<vmem>>, vector<16x1xf32>
    %12 = vector.broadcast %11 : vector<16x1xf32> to vector<16x256xf32>
    %13 = arith.addf %10, %12 : vector<16x256xf32>
    %cst_12 = arith.constant 0.000000e+00 : f32
    %14 = vector.broadcast %cst_12 : f32 to vector<16x256xf32>
    %15 = arith.maximumf %13, %14 : vector<16x256xf32>
    %c0_13 = arith.constant 0 : index
    %c0_14 = arith.constant 0 : index
    %c0_15 = arith.constant 0 : index
    %16 = vector.load %arg9[%c0_13, %c0_14, %c0_15] : memref<1x32x256xf32, #tpu.memory_space<vmem>>, vector<1x16x256xf32>
    %17 = vector.shape_cast %16 : vector<1x16x256xf32> to vector<16x256xf32>
    %18 = vector.shape_cast %15 : vector<16x256xf32> to vector<1x16x256xf32>
    tpu.vector_store %arg9[%c0_13, %c0_14, %c0_15], %18 {strides = array<i32>} : memref<1x32x256xf32, #tpu.memory_space<vmem>>, vector<1x16x256xf32>,
    %c17_i32 = arith.constant 17 : i32
    %19 = tpu.dynamic_rotate %8 by %c17_i32 dim 1 : vector<8x256xf32>, i32 -> vector<8x256xf32>
    %c0_16 = arith.constant 0 : index
    %c0_17 = arith.constant 0 : index
    %20 = vector.load %arg2[%c0_16, %c0_17] : memref<9x256xf32, #tpu.memory_space<vmem>>, vector<1x256xf32>
    %21 = vector.broadcast %20 : vector<1x256xf32> to vector<8x256xf32>
    %22 = arith.mulf %19, %21 : vector<8x256xf32>
    %c0_18 = arith.constant 0 : index
    %c0_19 = arith.constant 0 : index
    %23 = vector.load %arg10[%c0_18, %c0_19] : memref<72x256xf32, #tpu.memory_space<vmem>>, vector<8x256xf32>
    tpu.vector_store %arg10[%c0_18, %c0_19], %22 {strides = array<i32>} : memref<72x256xf32, #tpu.memory_space<vmem>>, vector<8x256xf32>,
    %c16_i32 = arith.constant 16 : i32
    %24 = tpu.dynamic_rotate %8 by %c16_i32 dim 1 : vector<8x256xf32>, i32 -> vector<8x256xf32>
    %c1 = arith.constant 1 : index
    %c0_20 = arith.constant 0 : index
    %25 = vector.load %arg2[%c1, %c0_20] : memref<9x256xf32, #tpu.memory_space<vmem>>, vector<1x256xf32>
    %26 = vector.broadcast %25 : vector<1x256xf32> to vector<8x256xf32>
    %27 = arith.mulf %24, %26 : vector<8x256xf32>
    %c8 = arith.constant 8 : index
    %c0_21 = arith.constant 0 : index
    %28 = vector.load %arg10[%c8, %c0_21] : memref<72x256xf32, #tpu.memory_space<vmem>>, vector<8x256xf32>
    tpu.vector_store %arg10[%c8, %c0_21], %27 {strides = array<i32>} : memref<72x256xf32, #tpu.memory_space<vmem>>, vector<8x256xf32>,
    %c15_i32 = arith.constant 15 : i32
    %29 = tpu.dynamic_rotate %8 by %c15_i32 dim 1 : vector<8x256xf32>, i32 -> vector<8x256xf32>
    %c2 = arith.constant 2 : index
    %c0_22 = arith.constant 0 : index
    %30 = vector.load %arg2[%c2, %c0_22] : memref<9x256xf32, #tpu.memory_space<vmem>>, vector<1x256xf32>
    %31 = vector.broadcast %30 : vector<1x256xf32> to vector<8x256xf32>
    %32 = arith.mulf %29, %31 : vector<8x256xf32>
    %c16 = arith.constant 16 : index
    %c0_23 = arith.constant 0 : index
    %33 = vector.load %arg10[%c16, %c0_23] : memref<72x256xf32, #tpu.memory_space<vmem>>, vector<8x256xf32>
    tpu.vector_store %arg10[%c16, %c0_23], %32 {strides = array<i32>} : memref<72x256xf32, #tpu.memory_space<vmem>>, vector<8x256xf32>,
    %c1_i32 = arith.constant 1 : i32
    %34 = tpu.dynamic_rotate %8 by %c1_i32 dim 1 : vector<8x256xf32>, i32 -> vector<8x256xf32>
    %c3 = arith.constant 3 : index
    %c0_24 = arith.constant 0 : index
    %35 = vector.load %arg2[%c3, %c0_24] : memref<9x256xf32, #tpu.memory_space<vmem>>, vector<1x256xf32>
    %36 = vector.broadcast %35 : vector<1x256xf32> to vector<8x256xf32>
    %37 = arith.mulf %34, %36 : vector<8x256xf32>
    %c24 = arith.constant 24 : index
    %c0_25 = arith.constant 0 : index
    %38 = vector.load %arg10[%c24, %c0_25] : memref<72x256xf32, #tpu.memory_space<vmem>>, vector<8x256xf32>
    tpu.vector_store %arg10[%c24, %c0_25], %37 {strides = array<i32>} : memref<72x256xf32, #tpu.memory_space<vmem>>, vector<8x256xf32>,
    %c4 = arith.constant 4 : index
    %c0_26 = arith.constant 0 : index
    %39 = vector.load %arg2[%c4, %c0_26] : memref<9x256xf32, #tpu.memory_space<vmem>>, vector<1x256xf32>
    %40 = vector.broadcast %39 : vector<1x256xf32> to vector<8x256xf32>
    %41 = arith.mulf %8, %40 : vector<8x256xf32>
    %c32 = arith.constant 32 : index
    %c0_27 = arith.constant 0 : index
    %42 = vector.load %arg10[%c32, %c0_27] : memref<72x256xf32, #tpu.memory_space<vmem>>, vector<8x256xf32>
    tpu.vector_store %arg10[%c32, %c0_27], %41 {strides = array<i32>} : memref<72x256xf32, #tpu.memory_space<vmem>>, vector<8x256xf32>,
    %c255_i32 = arith.constant 255 : i32
    %43 = tpu.dynamic_rotate %8 by %c255_i32 dim 1 : vector<8x256xf32>, i32 -> vector<8x256xf32>
    %c5 = arith.constant 5 : index
    %c0_28 = arith.constant 0 : index
    %44 = vector.load %arg2[%c5, %c0_28] : memref<9x256xf32, #tpu.memory_space<vmem>>, vector<1x256xf32>
    %45 = vector.broadcast %44 : vector<1x256xf32> to vector<8x256xf32>
    %46 = arith.mulf %43, %45 : vector<8x256xf32>
    %c40 = arith.constant 40 : index
    %c0_29 = arith.constant 0 : index
    %47 = vector.load %arg10[%c40, %c0_29] : memref<72x256xf32, #tpu.memory_space<vmem>>, vector<8x256xf32>
    tpu.vector_store %arg10[%c40, %c0_29], %46 {strides = array<i32>} : memref<72x256xf32, #tpu.memory_space<vmem>>, vector<8x256xf32>,
    %c241_i32 = arith.constant 241 : i32
    %48 = tpu.dynamic_rotate %8 by %c241_i32 dim 1 : vector<8x256xf32>, i32 -> vector<8x256xf32>
    %c6 = arith.constant 6 : index
    %c0_30 = arith.constant 0 : index
    %49 = vector.load %arg2[%c6, %c0_30] : memref<9x256xf32, #tpu.memory_space<vmem>>, vector<1x256xf32>
    %50 = vector.broadcast %49 : vector<1x256xf32> to vector<8x256xf32>
    %51 = arith.mulf %48, %50 : vector<8x256xf32>
    %c48 = arith.constant 48 : index
    %c0_31 = arith.constant 0 : index
    %52 = vector.load %arg10[%c48, %c0_31] : memref<72x256xf32, #tpu.memory_space<vmem>>, vector<8x256xf32>
    tpu.vector_store %arg10[%c48, %c0_31], %51 {strides = array<i32>} : memref<72x256xf32, #tpu.memory_space<vmem>>, vector<8x256xf32>,
    %c240_i32 = arith.constant 240 : i32
    %53 = tpu.dynamic_rotate %8 by %c240_i32 dim 1 : vector<8x256xf32>, i32 -> vector<8x256xf32>
    %c7 = arith.constant 7 : index
    %c0_32 = arith.constant 0 : index
    %54 = vector.load %arg2[%c7, %c0_32] : memref<9x256xf32, #tpu.memory_space<vmem>>, vector<1x256xf32>
    %55 = vector.broadcast %54 : vector<1x256xf32> to vector<8x256xf32>
    %56 = arith.mulf %53, %55 : vector<8x256xf32>
    %c56 = arith.constant 56 : index
    %c0_33 = arith.constant 0 : index
    %57 = vector.load %arg10[%c56, %c0_33] : memref<72x256xf32, #tpu.memory_space<vmem>>, vector<8x256xf32>
    tpu.vector_store %arg10[%c56, %c0_33], %56 {strides = array<i32>} : memref<72x256xf32, #tpu.memory_space<vmem>>, vector<8x256xf32>,
    %c239_i32 = arith.constant 239 : i32
    %58 = tpu.dynamic_rotate %8 by %c239_i32 dim 1 : vector<8x256xf32>, i32 -> vector<8x256xf32>
    %c8_34 = arith.constant 8 : index
    %c0_35 = arith.constant 0 : index
    %59 = vector.load %arg2[%c8_34, %c0_35] : memref<9x256xf32, #tpu.memory_space<vmem>>, vector<1x256xf32>
    %60 = vector.broadcast %59 : vector<1x256xf32> to vector<8x256xf32>
    %61 = arith.mulf %58, %60 : vector<8x256xf32>
    %c64 = arith.constant 64 : index
    %c0_36 = arith.constant 0 : index
    %62 = vector.load %arg10[%c64, %c0_36] : memref<72x256xf32, #tpu.memory_space<vmem>>, vector<8x256xf32>
    tpu.vector_store %arg10[%c64, %c0_36], %61 {strides = array<i32>} : memref<72x256xf32, #tpu.memory_space<vmem>>, vector<8x256xf32>,
    %c0_37 = arith.constant 0 : index
    %c0_38 = arith.constant 0 : index
    %63 = vector.load %arg7[%c0_37, %c0_38] : memref<16x72xf32, #tpu.memory_space<vmem>>, vector<16x72xf32>
    %c0_39 = arith.constant 0 : index
    %c0_40 = arith.constant 0 : index
    %64 = vector.load %arg10[%c0_39, %c0_40] : memref<72x256xf32, #tpu.memory_space<vmem>>, vector<72x256xf32>
    %cst_41 = arith.constant dense<0.000000e+00> : vector<16x256xf32>
    %65 = tpu.matmul %63, %64, %cst_41 {dimension_numbers = #tpu.dot_dimension_numbers<[1], [0], [0], [1], [0, 0, 1, 1], [], []>} : vector<16x72xf32>, vector<72x256xf32>, vector<16x256xf32> -> vector<16x256xf32>
    %c0_42 = arith.constant 0 : index
    %c0_43 = arith.constant 0 : index
    %66 = vector.load %arg8[%c0_42, %c0_43] : memref<16x1xf32, #tpu.memory_space<vmem>>, vector<16x1xf32>
    %67 = vector.broadcast %66 : vector<16x1xf32> to vector<16x256xf32>
    %68 = arith.addf %65, %67 : vector<16x256xf32>
    %cst_44 = arith.constant 0.000000e+00 : f32
    %69 = vector.broadcast %cst_44 : f32 to vector<16x256xf32>
    %70 = arith.maximumf %68, %69 : vector<16x256xf32>
    %c0_45 = arith.constant 0 : index
    %c16_46 = arith.constant 16 : index
    %c0_47 = arith.constant 0 : index
    %71 = vector.load %arg9[%c0_45, %c16_46, %c0_47] : memref<1x32x256xf32, #tpu.memory_space<vmem>>, vector<1x16x256xf32>
    %72 = vector.shape_cast %71 : vector<1x16x256xf32> to vector<16x256xf32>
    %73 = vector.shape_cast %70 : vector<16x256xf32> to vector<1x16x256xf32>
    tpu.vector_store %arg9[%c0_45, %c16_46, %c0_47], %73 {strides = array<i32>} : memref<1x32x256xf32, #tpu.memory_space<vmem>>, vector<1x16x256xf32>,
    return
  }
  func.func @transform_0(%arg0: i32) -> (i32, i32, i32) {
    %c0_i32 = arith.constant 0 : i32
    %c0_i32_0 = arith.constant 0 : i32
    %c0_i32_1 = arith.constant 0 : i32
    return %arg0, %c0_i32, %c0_i32_0 : i32, i32, i32
  }
  func.func @transform_1(%arg0: i32) -> (i32, i32) {
    %c0_i32 = arith.constant 0 : i32
    %c0_i32_0 = arith.constant 0 : i32
    %c0_i32_1 = arith.constant 0 : i32
    return %c0_i32, %c0_i32_0 : i32, i32
  }
  func.func @transform_2(%arg0: i32) -> (i32, i32) {
    %c0_i32 = arith.constant 0 : i32
    %c0_i32_0 = arith.constant 0 : i32
    %c0_i32_1 = arith.constant 0 : i32
    return %c0_i32, %c0_i32_0 : i32, i32
  }
  func.func @transform_3(%arg0: i32) -> (i32, i32) {
    %c0_i32 = arith.constant 0 : i32
    %c0_i32_0 = arith.constant 0 : i32
    %c0_i32_1 = arith.constant 0 : i32
    return %c0_i32, %c0_i32_0 : i32, i32
  }
  func.func @transform_4(%arg0: i32) -> (i32, i32) {
    %c0_i32 = arith.constant 0 : i32
    %c0_i32_0 = arith.constant 0 : i32
    %c0_i32_1 = arith.constant 0 : i32
    return %c0_i32, %c0_i32_0 : i32, i32
  }
  func.func @transform_5(%arg0: i32) -> (i32, i32) {
    %c0_i32 = arith.constant 0 : i32
    %c0_i32_0 = arith.constant 0 : i32
    %c0_i32_1 = arith.constant 0 : i32
    return %c0_i32, %c0_i32_0 : i32, i32
  }
  func.func @transform_6(%arg0: i32) -> (i32, i32) {
    %c0_i32 = arith.constant 0 : i32
    %c0_i32_0 = arith.constant 0 : i32
    %c0_i32_1 = arith.constant 0 : i32
    return %c0_i32, %c0_i32_0 : i32, i32
  }
  func.func @transform_7(%arg0: i32) -> (i32, i32) {
    %c0_i32 = arith.constant 0 : i32
    %c0_i32_0 = arith.constant 0 : i32
    %c0_i32_1 = arith.constant 0 : i32
    return %c0_i32, %c0_i32_0 : i32, i32
  }
  func.func @transform_8(%arg0: i32) -> (i32, i32, i32) {
    %c0_i32 = arith.constant 0 : i32
    %c0_i32_0 = arith.constant 0 : i32
    %c0_i32_1 = arith.constant 0 : i32
    return %arg0, %c0_i32, %c0_i32_0 : i32, i32, i32
  }
}

</mosaic_0001>

<bundles_post_ra>
// kernel: tpu_custom_call.1
= control target key start
LH: loop header
LB: loop body
LE: loop exit
PB: predicated region body
PF: predicated region fallthrough
CT: control target
= control target key end

     0   :  { %13 = vsyncpa [#allocation4], 0  ;;  %s1190_s0 = inlined_call_operand.vmem [shape: f32[2,4,256], index: 0, kind: input, shape index: {}]   ;;  %s1191_s1 = inlined_call_operand.vmem [shape: f32[9,256], index: 1, kind: input, shape index: {}]   ;;  %s1192_s2 = inlined_call_operand.vmem [shape: f32[8,4], index: 2, kind: input, shape index: {}]   ;;  %s1193_s3 = inlined_call_operand.vmem [shape: f32[8,1], index: 3, kind: input, shape index: {}]   ;;  %s1194_s4 = inlined_call_operand.vmem [shape: f32[16,8], index: 4, kind: input, shape index: {}]   ;;  %s1195_s5 = inlined_call_operand.vmem [shape: f32[16,1], index: 5, kind: input, shape index: {}]   ;;  %s1196_s6 = inlined_call_operand.vmem [shape: f32[16,72], index: 6, kind: input, shape index: {}]   ;;  %s1197_s7 = inlined_call_operand.vmem [shape: f32[16,1], index: 7, kind: input, shape index: {}]   ;;  %s1198_s8 = inlined_call_operand.hbm [shape: f32[2,32,256], index: 8, kind: output, shape index: {}]  }
   0x1   :  { %15 = vsyncpa [#allocation4 + $0x1], 0  ;;  %s992_s27 = smov 0   ;;  %s994_s28 = smov 0  }
   0x2   :  { %s996_s29 = smov 0   ;;  %s998_s30 = smov 0  }
   0x3 LB: > { %s1013_s9 = sadd.s32 4294967295, %s935_s30   ;;  %s769_s10 = sadd.s32 4294967294, %s935_s30   ;;  %s935_s30 = sphi %s998_s30, %s1204_s30   ;;  %s931_s29 = sphi %s996_s29, %s1203_s29   ;;  %s927_s28 = sphi %s994_s28, %s1202_s28   ;;  %s923_s27 = sphi %s992_s27, %s1201_s27  }
   0x4   : > { %s1017_s11 = sadd.s32 1, %s935_s30   ;;  %s201_s12 = sadd.s32 1, %s931_s29 }
   0x5   : > { %s198_s13 = ssub.s32 %s935_s30, %s1017_s11  ;;  %p211_p0 = scmp.ne.s32.totalorder %s931_s29, %s927_s28 }
   0x6   : > { %p199_p1 = scmp.eq.s32.totalorder %s198_s13, 0  ;;  %p212_p2 = scmp.eq.s32.totalorder %s1013_s9, 1 }
   0x7   : > { %p217_p3 = scmp.ne.s32.totalorder %s927_s28, %s923_s27  ;;  %p218_p4 = scmp.eq.s32.totalorder %s769_s10, 1 }
   0x8   : > { %s1028_s14 = scalar_select %p199_p1, %s931_s29, %s201_s12  }
   0x9   : > { %p1030_p5 = por %p212_p2, %p211_p0  ;;  %p1034_p6 = por %p218_p4, %p217_p3 }
   0xa   : > { %p772_p7 = scmp.ge.s32.totalorder %s935_s30, 1  ;;  %p265_p8 = scmp.lt.s32.totalorder %s935_s30, 3 }
   0xc   : > { %p266_p9 = pnand %p772_p7, %p265_p8 }
   0xd   : > { %p299_p10 = scmp.lt.s32.totalorder (!%p266_p9), %s1013_s9, 1  ;;  %s938_s12 = smov (!%p266_p9), 112  }
   0xe   : > { %269 = sbr.rel (%p266_p9) target bundleno = 464 (0x1d0), region = 52  ;;  %s939_s13 = smov (!%p266_p9), 111  }
   0xf   : > { %s942_s21 = smov (!%p266_p9), 1   ;;  %s943_s22 = smov (!%p266_p9), 15  }
  0x10   : > { %s945_s24 = smov (!%p266_p9), 17   ;;  %s296_s10 = sand.u32 (!%p266_p9), 1, %s927_s28  }
  0x13   : > { %v306_v0 = vld [vmem:[%s1193_s3] sm:$0xff]  ;;  %v937_v1 = vmov 0   ;;  %s300_s19 = scalar_select %p299_p10, %s1013_s9, 1  ;;  %vm320_vm0 = vcmask 1043456   ;;  %vm316_vm1 = vcmask 31744   ;;  %vm381_vm2 = vcmask 64512  }
  0x14   : > { %870 = vset.pattern.permute.xlu0 %v937_v1  ;;  %872 = vset.pattern.permute.xlu1 %v937_v1  ;;  %v305_v3 = vld [vmem:[%s1192_s2] sm:$0xff]  ;;  %v368_v14 = vld [vmem:[%s1194_s4 + $0x8] sm:$0xff]  ;;  %v446_v16 = vlaneseq  ;;  %v791_v19 = vld [vmem:[%s1191_s1 + $0x10] ss:$8 sm:$0x3]  ;;  %vm630_vm11 = vcmask 588800  }
  0x15   : > { %309 = vperm.xlu0 %870, %v306_v0   ;;  %871 = vset.pattern.permute.xlu2 %v937_v1  ;;  %s801_s20 = sshll.u32 %s300_s19, 3  ;;  %v367_v13 = vld [vmem:[%s1194_s4] sm:$0xff]  ;;  %s940_s19 = smov 113   ;;  %v370_v15 = vld [vmem:[%s1195_s5 + $0x8] sm:$0xff]  ;;  %v590_v20 = vperm.slane %v791_v19, 0  ;;  %v591_v21 = vperm.slane %v791_v19, 1 }
  0x16   : > { %s303_s23 = scalar_lea.vmem %s1190_s0, %s801_s20  ;;  %s941_s20 = smov 127   ;;  %v1088_v18 = vand.u32 127, %v446_v16  ;;  %v790_v29 = vld [vmem:[%s1191_s1 + $0x7] ss:$8 sm:$0x3] }
  0x17   : > { %v304_v2 = vld [vmem:[%s303_s23] sm:$0xff]  ;;  %s944_s23 = smov 16   ;;  %v572_v31 = vperm.slane %v790_v29, 0  ;;  %v573_v32 = vperm.slane %v790_v29, 1  ;;  %v619_v0 = vld [vmem:[%s1197_s7 + $0x8] sm:$0xff] }
  0x18   : > { %313 = vst [vmem:[#allocation1] ss:$2 sm:$0xff] %v304_v2  ;;  %vm584_vm3 = vcmp.lt.s32.totalorder %v1088_v18, 111  ;;  %v789_v30 = vld [vmem:[%s1191_s1 + $0x6] ss:$8 sm:$0x3] }
  0x19   : > { %vm566_vm4 = vcmp.lt.s32.totalorder %v1088_v18, 112  ;;  %vm548_vm5 = vcmp.lt.s32.totalorder %v1088_v18, 113  ;;  %v554_v34 = vperm.slane %v789_v30, 0  ;;  %v555_v38 = vperm.slane %v789_v30, 1  ;;  %v618_v50 = vld [vmem:[%s1197_s7] sm:$0xff] }
  0x1a   : > { %v788_v43 = vld [vmem:[%s1191_s1 + $0x5] ss:$8 sm:$0x3]  ;;  %v787_v47 = vld [vmem:[%s1191_s1 + $0x4] ss:$8 sm:$0x3] }
  0x1b   : > { %vm530_vm6 = vcmp.lt.s32.totalorder %v1088_v18, 127  ;;  %v536_v48 = vperm.slane %v788_v43, 0  ;;  %v537_v49 = vperm.slane %v788_v43, 1  ;;  %v369_v51 = vld [vmem:[%s1195_s5] sm:$0xff]  ;;  %v518_v53 = vperm.slane %v787_v47, 0 }
  0x1c   : > { %v519_v57 = vperm.slane %v787_v47, 1  ;;  %v786_v60 = vld [vmem:[%s1191_s1 + $0x3] ss:$8 sm:$0x3]  ;;  %vm501_vm7 = vcmp.lt.s32.totalorder %v1088_v18, 1  ;;  %vm483_vm8 = vcmp.lt.s32.totalorder %v1088_v18, 15 }
  0x1d   : > { %v785_v63 = vld [vmem:[%s1191_s1 + $0x2] ss:$8 sm:$0x3]  ;;  %v507_v2 = vperm.slane %v786_v60, 0  ;;  %vm465_vm9 = vcmp.lt.s32.totalorder %v1088_v18, 16  ;;  %vm448_vm10 = vcmp.lt.s32.totalorder %v1088_v18, 17 }
  0x1e   : > { %v451_v29 = vld [vmem:[%s1191_s1] ss:$8 sm:$0x3] }
  0x1f   : > { %v314_v4 = vld.sshfl [vmem:[#allocation1] sm:$0xff pattern:$0x75316420]  ;;  %v315_v5 = vld.sshfl [vmem:[#allocation1 + $0x8] sm:$0xff pattern:$0x75316420] }
  0x20   : > { %776 = vmatpush.msk.msra.mxu0 %vm320_vm0, %v314_v4  ;;  %778 = vmatpush.msk.msra.mxu1 %vm320_vm0, %v315_v5  ;;  %v489_v5 = vperm.slane %v785_v63, 0  ;;  %v453_v30 = vperm.slane %v451_v29, 0 }
  0x21   : > { %777 = vmatmul.msk.f32.vlgmr.msra.gmra.mxu0 %vm316_vm1, %v305_v3  ;;  %779 = vmatmul.msk.f32.vlgmr.msra.gmra.mxu1 %vm316_vm1, %v305_v3  ;;  %v508_v3 = vperm.slane %v786_v60, 1 }
  0x87   : > { %v310_v6 = vpop.permute.xlu0 %309 }
  0x9e   : > { %v342_v7 = vpop.f32.mrf.mxu0  ;;  %v362_v8 = vpop.f32.mrf.mxu1 }
  0x9f   : > { %v343_v9 = vadd.f32 %v342_v7, %v310_v6  ;;  %v363_v10 = vadd.f32 %v362_v8, %v310_v6 }
  0xa1   : > { %v1051_v11 = vmax.f32 %v343_v9, 0.0  ;;  %v1053_v12 = vmax.f32 %v363_v10, 0.0  ;;  %v490_v9 = vperm.slane %v785_v63, 1 }
  0xa3   : > { %564 = vrot.lane.b32.xlu2 %v1053_v12, %s938_s12  ;;  %582 = vrot.lane.b32.xlu1 %v1053_v12, %s939_s13  ;;  %v522_v61 = vmul.f32 %v518_v53, %v1051_v11  ;;  %v523_v62 = vmul.f32 %v519_v57, %v1053_v12 }
  0xa4   : > { %426 = vmatpush.msra.mxu3 %v1053_v12  ;;  %580 = vrot.lane.b32.xlu0 %v1051_v11, %s939_s13 }
  0xa5   : > { %403 = vmatpush.msra.mxu2 %v1051_v11  ;;  %782 = vmatmul.msk.f32.vlgmr.msra.gmra.mxu3 %vm381_vm2, %v367_v13 }
  0xa6   : > { %780 = vmatmul.msk.f32.vlgmr.msra.gmra.mxu2 %vm381_vm2, %v367_v13 }
  0xab   : > { %544 = vrot.lane.b32.xlu2 %v1051_v11, %s940_s19  ;;  %562 = vrot.lane.b32.xlu1 %v1051_v11, %s938_s12  ;;  %s773_s12 = sshll.u32 %s296_s10, 6 }
  0xac   : > { %546 = vrot.lane.b32.xlu0 %v1053_v12, %s940_s19 }
  0xad   : > { %783 = vmatmul.msk.f32.gmra.mxu3 %vm381_vm2, %v368_v14 }
  0xae   : > { %781 = vmatmul.msk.f32.gmra.mxu2 %vm381_vm2, %v368_v14  ;;  %v784_v14 = vld [vmem:[%s1191_s1 + $0x1] ss:$8 sm:$0x3] }
  0xb3   : > { %528 = vrot.lane.b32.xlu2 %v1053_v12, %s941_s20  ;;  %526 = vrot.lane.b32.xlu1 %v1051_v11, %s941_s20  ;;  %s1145_s20 = scalar_lea.vmem [#allocation3], %s773_s12  ;;  %s692_s12 = scalar_lea.sflag [#allocation4], %s296_s10 }
  0xb4   : > { %497 = vrot.lane.b32.xlu0 %v1051_v11, %s942_s21  ;;  %s704_s26 = sshll.u32 %s1145_s20, 4  ;;  %s705_s26 = int_to_ptr.vmem [resolvable:$true] %s704_s26 }
  0xbb   : > { %479 = vrot.lane.b32.xlu2 %v1051_v11, %s943_s22  ;;  %499 = vrot.lane.b32.xlu1 %v1053_v12, %s942_s21  ;;  %s802_s21 = sshll.u32 %s1013_s9, 6 }
  0xbc   : > { %481 = vrot.lane.b32.xlu0 %v1053_v12, %s943_s22  ;;  %s703_s25 = scalar_lea.hbm %s1198_s8, %s802_s21  ;;  %s893_s21 = scalar_lea.hbm %s1198_s8, 128 }
  0xbd   : > { %s706_s9 = sshll.u32 %s703_s25, 4  ;;  %s707_s9 = int_to_ptr.hbm [resolvable:$true] %s706_s9 }
  0xbe   : > { %s887_s13 = sshra.s32 %s707_s9, 4  ;;  %s888_s13 = int_to_ptr.hbm [resolvable:$true] %s887_s13 }
  0xbf   : > { %s889_s17 = scalar_lea.hbm %s888_s13, 64  ;;  %p894_p0 = scmp.lt.s32.totalorder %s888_s13, %s1198_s8 }
  0xc0   : > { %p890_p11 = scmp.ne.s32.totalorder %s888_s13, %s889_s17  ;;  %p895_p1 = scmp.lt.s32.totalorder %s893_s21, %s889_s17 }
  0xc2   : > { %p891_p12 = pnand %p890_p11, %p1030_p5  ;;  %p896_p2 = por %p895_p1, %p894_p0 }
  0xc3   : > { %463 = vrot.lane.b32.xlu2 %v1053_v12, %s944_s23  ;;  %461 = vrot.lane.b32.xlu1 %v1051_v11, %s944_s23 }
  0xc4   : > { %442 = vrot.lane.b32.xlu0 %v1051_v11, %s945_s24  ;;  %p892_p13 = pneg %p891_p12 }
  0xc6   : > { %p897_p3 = pnand %p896_p2, %p892_p13 }
  0xcb   : > { %444 = vrot.lane.b32.xlu1 %v1053_v12, %s945_s24  ;;  %373 = vperm.xlu2 %871, %v369_v51  }
  0xcc   : > { %378 = vperm.xlu0 %870, %v370_v15  }
  0xd3   : > { %622 = vperm.xlu1 %872, %v618_v50   ;;  %627 = vperm.xlu2 %871, %v619_v0  }
  0xfd   : > { %v565_v17 = vpop.permute.xlu2 %564 }
 0x105   : > { %v545_v24 = vpop.permute.xlu2 %544 }
 0x10d   : > { %v529_v44 = vpop.permute.xlu2 %528 }
 0x115   : > { %v583_v22 = vpop.permute.xlu1 %582  ;;  %v480_v1 = vpop.permute.xlu2 %479 }
 0x116   : > { %v581_v23 = vpop.permute.xlu0 %580 }
 0x117   : > { %v585_v25 = vsel %vm584_vm3, %v581_v23, %v583_v22  ;;  %v586_v26 = vsel %vm584_vm3, %v583_v22, %v581_v23 }
 0x118   : > { %v594_v27 = vmul.f32 %v590_v20, %v585_v25  ;;  %v595_v28 = vmul.f32 %v591_v21, %v586_v26  ;;  %v471_v20 = vperm.slane %v784_v14, 0  ;;  %v472_v21 = vperm.slane %v784_v14, 1 }
 0x11a   : > { %644 = vmatpush.msrb.mxu0 %v594_v27  ;;  %803 = vmatpush.msrb.mxu2 %v594_v27 }
 0x11b   : > { %667 = vmatpush.msrb.mxu1 %v595_v28  ;;  %812 = vmatpush.msrb.mxu3 %v595_v28 }
 0x11d   : > { %v563_v33 = vpop.permute.xlu1 %562  ;;  %v464_v22 = vpop.permute.xlu2 %463 }
 0x11e   : > { %v567_v35 = vsel %vm566_vm4, %v563_v33, %v565_v17  ;;  %v568_v36 = vsel %vm566_vm4, %v565_v17, %v563_v33  ;;  %v547_v37 = vpop.permute.xlu0 %546 }
 0x11f   : > { %v549_v39 = vsel %vm548_vm5, %v545_v24, %v547_v37  ;;  %v550_v40 = vsel %vm548_vm5, %v547_v37, %v545_v24  ;;  %v576_v41 = vmul.f32 %v572_v31, %v567_v35  ;;  %v577_v42 = vmul.f32 %v573_v32, %v568_v36 }
 0x120   : > { %v558_v45 = vmul.f32 %v554_v34, %v549_v39  ;;  %v559_v46 = vmul.f32 %v555_v38, %v550_v40  ;;  %v454_v31 = vperm.slane %v451_v29, 1 }
 0x121   : > { %645 = vmatpush.msrb.mxu0 %v576_v41  ;;  %804 = vmatpush.msrb.mxu2 %v576_v41 }
 0x122   : > { %668 = vmatpush.msrb.mxu1 %v577_v42  ;;  %813 = vmatpush.msrb.mxu3 %v577_v42  ;;  %v599_v42 = vld [vmem:[%s1196_s6 + $0x8] sm:$0xff] }
 0x123   : > { %646 = vmatpush.msrb.mxu0 %v558_v45  ;;  %805 = vmatpush.msrb.mxu2 %v558_v45 }
 0x124   : > { %669 = vmatpush.msrb.mxu1 %v559_v46  ;;  %814 = vmatpush.msrb.mxu3 %v559_v46 }
 0x125   : > { %v527_v52 = vpop.permute.xlu1 %526  ;;  %v374_v45 = vpop.permute.xlu2 %373 }
 0x126   : > { %v531_v54 = vsel %vm530_vm6, %v527_v52, %v529_v44  ;;  %v532_v55 = vsel %vm530_vm6, %v529_v44, %v527_v52  ;;  %v498_v56 = vpop.permute.xlu0 %497  ;;  %v598_v44 = vld [vmem:[%s1196_s6] sm:$0xff] }
 0x127   : > { %v540_v58 = vmul.f32 %v536_v48, %v531_v54  ;;  %v541_v59 = vmul.f32 %v537_v49, %v532_v55 }
 0x128   : > { %v428_v17 = vpop.f32.mrf.mxu3 }
 0x129   : > { %647 = vmatpush.msrb.mxu0 %v540_v58  ;;  %806 = vmatpush.msrb.mxu2 %v540_v58  ;;  %v405_v19 = vpop.f32.mrf.mxu2  ;;  %v429_v47 = vadd.f32 %v428_v17, %v374_v45 }
 0x12a   : > { %670 = vmatpush.msrb.mxu1 %v541_v59  ;;  %815 = vmatpush.msrb.mxu3 %v541_v59  ;;  %v406_v46 = vadd.f32 %v405_v19, %v374_v45 }
 0x12b   : > { %648 = vmatpush.msrb.mxu0 %v522_v61  ;;  %807 = vmatpush.msrb.mxu2 %v522_v61  ;;  %v435_v49 = vmax.f32 %v429_v47, 0.0 }
 0x12c   : > { %671 = vmatpush.msrb.mxu1 %v523_v62  ;;  %816 = vmatpush.msrb.mxu3 %v523_v62  ;;  %v434_v48 = vmax.f32 %v406_v46, 0.0 }
 0x12d   : > { %v500_v4 = vpop.permute.xlu1 %499  ;;  %439 = vst [vmem:[%s1145_s20 + $0x8] sm:$0xff] %v435_v49  ;;  %v628_v57 = vpop.permute.xlu2 %627 }
 0x12e   : > { %v502_v6 = vsel %vm501_vm7, %v498_v56, %v500_v4  ;;  %v503_v7 = vsel %vm501_vm7, %v500_v4, %v498_v56  ;;  %v482_v8 = vpop.permute.xlu0 %481  ;;  %438 = vst [vmem:[%s1145_s20] sm:$0xff] %v434_v48 }
 0x12f   : > { %v484_v10 = vsel %vm483_vm8, %v480_v1, %v482_v8  ;;  %v485_v11 = vsel %vm483_vm8, %v482_v8, %v480_v1  ;;  %v511_v12 = vmul.f32 %v507_v2, %v503_v7  ;;  %v512_v13 = vmul.f32 %v508_v3, %v502_v6 }
 0x130   : > { %v493_v15 = vmul.f32 %v489_v5, %v485_v11  ;;  %v494_v16 = vmul.f32 %v490_v9, %v484_v10  ;;  %v431_v32 = vpop.f32.mrf.mxu3 }
 0x131   : > { %649 = vmatpush.msrb.mxu0 %v511_v12  ;;  %808 = vmatpush.msrb.mxu2 %v511_v12  ;;  %v408_v33 = vpop.f32.mrf.mxu2 }
 0x132   : > { %672 = vmatpush.msrb.mxu1 %v512_v13  ;;  %817 = vmatpush.msrb.mxu3 %v512_v13 }
 0x133   : > { %650 = vmatpush.msrb.mxu0 %v493_v15  ;;  %809 = vmatpush.msrb.mxu2 %v493_v15 }
 0x134   : > { %673 = vmatpush.msrb.mxu1 %v494_v16  ;;  %818 = vmatpush.msrb.mxu3 %v494_v16 }
 0x135   : > { %v462_v23 = vpop.permute.xlu1 %461 }
 0x136   : > { %v466_v24 = vsel %vm465_vm9, %v462_v23, %v464_v22  ;;  %v467_v25 = vsel %vm465_vm9, %v464_v22, %v462_v23  ;;  %v443_v26 = vpop.permute.xlu0 %442 }
 0x137   : > { %v475_v27 = vmul.f32 %v471_v20, %v467_v25  ;;  %v476_v28 = vmul.f32 %v472_v21, %v466_v24 }
 0x139   : > { %651 = vmatpush.msrb.mxu0 %v475_v27  ;;  %810 = vmatpush.msrb.mxu2 %v475_v27 }
 0x13a   : > { %674 = vmatpush.msrb.mxu1 %v476_v28  ;;  %819 = vmatpush.msrb.mxu3 %v476_v28 }
 0x13d   : > { %v445_v34 = vpop.permute.xlu1 %444 }
 0x13e   : > { %v449_v35 = vsel %vm448_vm10, %v443_v26, %v445_v34  ;;  %v450_v36 = vsel %vm448_vm10, %v445_v34, %v443_v26  ;;  %v379_v37 = vpop.permute.xlu0 %378 }
 0x13f   : > { %v432_v38 = vadd.f32 %v431_v32, %v379_v37  ;;  %v409_v39 = vadd.f32 %v408_v33, %v379_v37  ;;  %v457_v40 = vmul.f32 %v453_v30, %v450_v36  ;;  %v458_v41 = vmul.f32 %v454_v31, %v449_v35 }
 0x141   : > { %v437_v18 = vmax.f32 %v432_v38, 0.0  ;;  %v436_v43 = vmax.f32 %v409_v39, 0.0  ;;  %652 = vmatpush.msrb.mxu0 %v457_v40  ;;  %811 = vmatpush.msrb.mxu2 %v457_v40 }
 0x142   : > { %675 = vmatpush.msrb.mxu1 %v458_v41  ;;  %820 = vmatpush.msrb.mxu3 %v458_v41 }
 0x143   : > { %441 = vst [vmem:[%s1145_s20 + $0x18] sm:$0xff] %v437_v18  ;;  %793 = vmatmul.msk.f32.vlgmr.msrb.gmra.mxu2 %vm630_vm11, %v599_v42  ;;  %795 = vmatmul.msk.f32.vlgmr.msrb.gmra.mxu3 %vm630_vm11, %v599_v42 }
 0x144   : > { %440 = vst [vmem:[%s1145_s20 + $0x10] sm:$0xff] %v436_v43  ;;  %792 = vmatmul.msk.f32.vlgmr.msrb.gmra.mxu0 %vm630_vm11, %v598_v44  ;;  %794 = vmatmul.msk.f32.vlgmr.msrb.gmra.mxu1 %vm630_vm11, %v598_v44 }
 0x145   : > { %v623_v50 = vpop.permute.xlu1 %622 }
 0x1c1   : > { %v654_v51 = vpop.f32.mrf.mxu0  ;;  %v677_v52 = vpop.f32.mrf.mxu1 }
 0x1c2   : > { %v655_v53 = vadd.f32 %v654_v51, %v623_v50  ;;  %v678_v54 = vadd.f32 %v677_v52, %v623_v50 }
 0x1c4   : > { %v683_v55 = vmax.f32 %v655_v53, 0.0  ;;  %v684_v56 = vmax.f32 %v678_v54, 0.0 }
 0x1c6   : > { %687 = vst [vmem:[%s1145_s20 + $0x20] sm:$0xff] %v683_v55  ;;  %v657_v58 = vpop.f32.mrf.mxu2  ;;  %v680_v59 = vpop.f32.mrf.mxu3 }
 0x1c7   : > { %v658_v60 = vadd.f32 %v657_v58, %v628_v57  ;;  %688 = vst [vmem:[%s1145_s20 + $0x28] sm:$0xff] %v684_v56  ;;  %v681_v61 = vadd.f32 %v680_v59, %v628_v57 }
 0x1c9   : > { %v685_v62 = vmax.f32 %v658_v60, 0.0  ;;  %v686_v63 = vmax.f32 %v681_v61, 0.0 }
 0x1cb   : > { %689 = vst [vmem:[%s1145_s20 + $0x30] sm:$0xff] %v685_v62 }
 0x1cc   : > { %690 = vst [vmem:[%s1145_s20 + $0x38] sm:$0xff] %v686_v63 }
 0x1cd   : > { %900 = shalt.err (!%p897_p3)
}
 0x1ce   : > { %s946_s10 = smov 256  }
 0x1cf   : > { %821 = dma.vmem_to_hbm [thread:$0]  (%p1030_p5), %s705_s26, 1024, %s707_s9, %s692_s12, %s946_s10, %s946_s10, %s944_s23  }
 0x1d0 PF: > { %p827_p4 = scmp.ge.s32.totalorder %s935_s30, 2  ;;  %s721_s20 = sand.u32 1, %s923_s27  }
 0x1d1   : > { %s722_s25 = scalar_lea.sflag [#allocation4], %s721_s20 }
 0x1d2   : > { %p824_p7 = pnand %p827_p4, %p1034_p6 }
 0x1d4   : > { %p825_p8 = pneg %p824_p7 }
 0x1d6   : > { %918 = dma.done.wait (%p825_p8), %s722_s25, 1024  }
 0x1d7   : > { %920 = vsyncadd (%p825_p8), %s722_s25, 4294966272  ;;  %p18_p9 = scmp.ge.s32.totalorder %s1017_s11, 4   ;;  %s1201_s27 = smov %s927_s28 }
 0x1d8   : > { %s1202_s28 = smov %s931_s29  ;;  %s1203_s29 = smov %s1028_s14 }
 0x1d9   : > { %s1204_s30 = smov %s1017_s11  ;;  %20 = sbr.rel (!%p18_p9) target bundleno = 3 (0x3), region = 95 }
 0x1de   :  { %728 = vsyncpa [#allocation4], 1 }
 0x1df   :  { %730 = vsyncpa [#allocation4 + $0x1], 1 }

</bundles_post_ra>
